<compile_context>
chip_gen: v6e
topology: v6e:2x2x1
jax: 0.10.0
libtpu: 0.0.40
codegen_flags: <defaults>
</compile_context>

<pallas_src>
import functools

import jax
import jax.numpy as jnp
from jax.experimental import pallas as pl
from jax.experimental.pallas import tpu as pltpu


def _round_up(n, m):
    return ((n + m - 1) // m) * m


def _pad_to(a, shape):
    pads = [(0, s - d) for d, s in zip(a.shape, shape)]
    if any(p[1] for p in pads):
        a = jnp.pad(a, pads)
    return a


def _vmem_cap_bytes():
    """Usable scoped-VMEM cap: ~3/4 of physical per-core VMEM (64 MiB on v7x,
    128 MiB on v5e/v6e), leaving headroom for Mosaic-internal scratch."""
    try:
        phys = int(pltpu.get_tpu_info().vmem_capacity_bytes)
    except Exception:  # conservative (v7x-sized) fallback
        phys = 64 * 1024 * 1024
    return max(16 * 1024 * 1024, (phys * 3) // 4)


# --------------------------------- kernels ----------------------------------


def _fused_merge_matmul_kernel(alpha_ref,                     # SMEM (M,) f32, beta folded in
                               x_ref, base_w_ref, tv_w_ref,   # VMEM tiles
                               b_ref,
                               out_ref,
                               *acc_scratch,
                               num_models, dot_dtype, multi_k):
    """One (i, j, k) grid step of the fused merge + matmul.

    x_ref      : (TB, TK)     batch/contraction tile of x (bf16 or f32)
    base_w_ref : (TK, TN)     beta-scaled base weight tile
    tv_w_ref   : (M, TK, TN)  stacked task-vector weight tiles
    b_ref      : (1, TN)      pre-merged, beta-scaled bias tile (f32)
    out_ref    : (TB, TN)
    acc_scratch: ((TB, TN) f32,) only present when the K axis has >1 tiles
    """
    # Per-tile merged weight: upcast to f32 for the VPU merge; the full (H, O)
    # merged weight is never materialized.
    w_blk = base_w_ref[...].astype(jnp.float32)
    for m in range(num_models):                      # tiny static loop over models
        w_blk = w_blk + alpha_ref[m] * tv_w_ref[m].astype(jnp.float32)

    x_blk = x_ref[...]
    if dot_dtype is not None:                        # MXU-native operands, f32 acc
        x_blk = x_blk.astype(dot_dtype)
        w_blk = w_blk.astype(dot_dtype)

    y_blk = jnp.dot(x_blk, w_blk, preferred_element_type=jnp.float32)

    if multi_k:
        acc_ref = acc_scratch[0]
        k = pl.program_id(2)

        @pl.when(k == 0)
        def _():
            acc_ref[...] = jnp.zeros_like(acc_ref)

        acc_ref[...] += y_blk

        @pl.when(k == pl.num_programs(2) - 1)
        def _():
            out_ref[...] = (acc_ref[...] + b_ref[...].astype(jnp.float32)
                            ).astype(out_ref.dtype)
    else:
        # Single-K-tile specialization: no scratch, no init/epilogue gating.
        out_ref[...] = (y_blk + b_ref[...].astype(jnp.float32)).astype(out_ref.dtype)


def _merge_weights_kernel(alpha_ref, base_w_ref, tv_w_ref, w_out_ref, *, num_models):
    """Two-pass mode, pass 1: write the merged (beta-folded) weight once."""
    w_blk = base_w_ref[...].astype(jnp.float32)
    for m in range(num_models):
        w_blk = w_blk + alpha_ref[m] * tv_w_ref[m].astype(jnp.float32)
    w_out_ref[...] = w_blk.astype(w_out_ref.dtype)


def _matmul_bias_kernel(x_ref, w_ref, b_ref, out_ref, *acc_scratch,
                        dot_dtype, multi_k):
    """Two-pass mode, pass 2: plain tiled matmul + pre-merged bias add."""
    x_blk = x_ref[...]
    w_blk = w_ref[...]
    if dot_dtype is not None:
        x_blk = x_blk.astype(dot_dtype)
        w_blk = w_blk.astype(dot_dtype)
    y_blk = jnp.dot(x_blk, w_blk, preferred_element_type=jnp.float32)

    if multi_k:
        acc_ref = acc_scratch[0]
        k = pl.program_id(2)

        @pl.when(k == 0)
        def _():
            acc_ref[...] = jnp.zeros_like(acc_ref)

        acc_ref[...] += y_blk

        @pl.when(k == pl.num_programs(2) - 1)
        def _():
            out_ref[...] = (acc_ref[...] + b_ref[...].astype(jnp.float32)
                            ).astype(out_ref.dtype)
    else:
        out_ref[...] = (y_blk + b_ref[...].astype(jnp.float32)).astype(out_ref.dtype)


# --------------------------------- wrapper ----------------------------------


def weighted_merge_forward(x, base_params, task_vectors, alpha_raw, beta,
                           normalization="softmax",
                           weight_dtype=jnp.bfloat16,   # HBM storage of weight streams
                           dot_dtype=jnp.bfloat16,      # MXU operand dtype (None -> f32 dot)
                           two_pass_batch_tiles=3):
    # ---- glue: alpha normalization (matches WeightedMergeLayer.alpha) ----
    if normalization == "none":
        alpha = alpha_raw
    elif normalization == "softmax":
        alpha = jax.nn.softmax(alpha_raw, axis=1)
    elif normalization == "tanh":
        alpha = jnp.tanh(alpha_raw)
    else:
        raise ValueError(f"Unsupported normalization method: {normalization}")

    # alpha rows keyed by parameter-name order of the task vectors (the module
    # enumerates self.checkpoints[0].keys()); resolved by name, not position.
    param_names = list(task_vectors[0].keys())
    idx_w = param_names.index("weight")
    idx_b = param_names.index("bias")

    base_w = base_params["weight"].astype(jnp.float32)                            # (H, O)
    base_b = base_params["bias"].astype(jnp.float32)                              # (1, O)
    tv_w = jnp.stack([tv["weight"] for tv in task_vectors]).astype(jnp.float32)   # (M, H, O)
    tv_b = jnp.stack([tv["bias"] for tv in task_vectors]).astype(jnp.float32)     # (M, 1, O)
    M = len(task_vectors)

    alpha_w = alpha[idx_w].astype(jnp.float32)                                    # (M,)
    alpha_b = alpha[idx_b].astype(jnp.float32)                                    # (M,)
    beta_f = jnp.asarray(beta, jnp.float32)

    # ---- hoisted glue (O((M+1)*O), free in XLA): bias merge + beta fold ----
    #   out = beta * (x @ (base_w + sum a_w tv_w) + (base_b + sum a_b tv_b))
    #       = x @ (beta*base_w + sum (beta*a_w) tv_w) + beta*(base_b + sum a_b tv_b)
    b_merged = beta_f * (base_b + jnp.einsum("m,mpo->po", alpha_b, tv_b))         # (1, O)
    alpha_w_folded = beta_f * alpha_w                                             # (M,)
    base_w_scaled = beta_f * base_w                                               # (H, O)

    B, H = x.shape
    O = base_w.shape[1]

    x_store = dot_dtype if dot_dtype is not None else jnp.float32
    w_bytes = jnp.dtype(weight_dtype).itemsize
    x_bytes = jnp.dtype(x_store).itemsize

    # ---- tile sizes: lane/sublane aligned, sized against per-core VMEM ----
    TN = min(512, _round_up(O, 128))
    TK = min(512, _round_up(H, 128))
    TB = min(512, _round_up(B, 8))

    vmem_cap = _vmem_cap_bytes()
    w_budget = min(32 * 1024 * 1024, vmem_cap // 2)   # double-buffered weight streams
    while 2 * (M + 1) * TK * TN * w_bytes > w_budget and TK > 128:
        TK //= 2
    while 2 * (M + 1) * TK * TN * w_bytes > w_budget and TN > 128:
        TN //= 2
    TK = max(TK, 128)
    TN = max(TN, 128)

    B_pad = _round_up(B, TB)
    H_pad = _round_up(H, TK)
    O_pad = _round_up(O, TN)

    # Best effort: give both v7x TensorCores work on the parallel axes.
    if (B_pad // TB) * (O_pad // TN) < 2:
        if O_pad // TN < 2 and TN % 256 == 0:
            TN //= 2
        elif B_pad // TB < 2 and TB % 32 == 0:
            TB //= 2
        O_pad = _round_up(O, TN)
        B_pad = _round_up(B, TB)

    n_b, n_o, n_k = B_pad // TB, O_pad // TN, H_pad // TK
    multi_k = n_k > 1

    # Zero-padding is semantics-preserving: padded x columns hit all-zero w
    # rows; padded output rows/cols are sliced off below.
    x_p = _pad_to(x.astype(jnp.float32), (B_pad, H_pad)).astype(x_store)
    base_w_p = _pad_to(base_w_scaled, (H_pad, O_pad)).astype(weight_dtype)
    tv_w_p = _pad_to(tv_w, (M, H_pad, O_pad)).astype(weight_dtype)
    b_p = _pad_to(b_merged, (1, O_pad))                    # stays f32 (tiny)

    # ---- working-set-sized VMEM limit, never the whole per-core VMEM ----
    need = 2 * (TB * TK * x_bytes + (M + 1) * TK * TN * w_bytes
                + TN * 4 + TB * TN * 4) + (TB * TN * 4 if multi_k else 0)
    vmem_limit = int(min(max(need + 8 * 1024 * 1024, 16 * 1024 * 1024), vmem_cap))

    acc_scratch = [pltpu.VMEM((TB, TN), jnp.float32)] if multi_k else []

    if n_b >= two_pass_batch_tiles:
        # ------- two-pass: merge the weights once, then stream them --------
        # Pass 1: W_merged (H_pad, O_pad) written to HBM once, instead of
        # re-reading / re-merging the (M+1) streams once per batch tile.
        w_merged = pl.pallas_call(
            functools.partial(_merge_weights_kernel, num_models=M),
            out_shape=jax.ShapeDtypeStruct((H_pad, O_pad), weight_dtype),
            grid_spec=pltpu.PrefetchScalarGridSpec(
                num_scalar_prefetch=1,                         # alpha -> SMEM
                grid=(n_k, n_o),
                in_specs=[
                    pl.BlockSpec((TK, TN), lambda i, j, *_: (i, j)),        # base_w
                    pl.BlockSpec((M, TK, TN), lambda i, j, *_: (0, i, j)),  # tv_w
                ],
                out_specs=pl.BlockSpec((TK, TN), lambda i, j, *_: (i, j)),
            ),
            compiler_params=pltpu.CompilerParams(
                dimension_semantics=("parallel", "parallel"),
                vmem_limit_bytes=vmem_limit),
        )(alpha_w_folded, base_w_p, tv_w_p)

        # Pass 2: plain tiled matmul + pre-merged bias.
        out_p = pl.pallas_call(
            functools.partial(_matmul_bias_kernel,
                              dot_dtype=dot_dtype, multi_k=multi_k),
            out_shape=jax.ShapeDtypeStruct((B_pad, O_pad), jnp.float32),
            grid_spec=pltpu.PrefetchScalarGridSpec(
                num_scalar_prefetch=0,
                grid=(n_b, n_o, n_k),
                in_specs=[
                    pl.BlockSpec((TB, TK), lambda i, j, k: (i, k)),   # x
                    pl.BlockSpec((TK, TN), lambda i, j, k: (k, j)),   # W_merged
                    pl.BlockSpec((1, TN), lambda i, j, k: (0, j)),    # bias
                ],
                out_specs=pl.BlockSpec((TB, TN), lambda i, j, k: (i, j)),
                scratch_shapes=acc_scratch,
            ),
            compiler_params=pltpu.CompilerParams(
                dimension_semantics=("parallel", "parallel", "arbitrary"),
                vmem_limit_bytes=vmem_limit),
            cost_estimate=pl.CostEstimate(
                flops=2 * B_pad * H_pad * O_pad,
                transcendentals=0,
                bytes_accessed=int(x_bytes * B_pad * H_pad
                                   + w_bytes * n_b * H_pad * O_pad
                                   + 4 * O_pad + 4 * B_pad * O_pad)),
        )(x_p, w_merged, b_p)
    else:
        # ---------------- single-pass fused merge + matmul ------------------
        out_p = pl.pallas_call(
            functools.partial(_fused_merge_matmul_kernel, num_models=M,
                              dot_dtype=dot_dtype, multi_k=multi_k),
            out_shape=jax.ShapeDtypeStruct((B_pad, O_pad), jnp.float32),
            grid_spec=pltpu.PrefetchScalarGridSpec(
                num_scalar_prefetch=1,                         # alpha -> SMEM
                grid=(n_b, n_o, n_k),
                in_specs=[
                    pl.BlockSpec((TB, TK), lambda i, j, k, *_: (i, k)),        # x
                    pl.BlockSpec((TK, TN), lambda i, j, k, *_: (k, j)),        # base_w
                    pl.BlockSpec((M, TK, TN), lambda i, j, k, *_: (0, k, j)),  # tv_w
                    pl.BlockSpec((1, TN), lambda i, j, k, *_: (0, j)),         # bias
                ],
                out_specs=pl.BlockSpec((TB, TN), lambda i, j, k, *_: (i, j)),
                scratch_shapes=acc_scratch,
            ),
            compiler_params=pltpu.CompilerParams(
                dimension_semantics=("parallel", "parallel", "arbitrary"),
                vmem_limit_bytes=vmem_limit),
            cost_estimate=pl.CostEstimate(
                flops=2 * B_pad * H_pad * O_pad + 2 * M * n_b * H_pad * O_pad,
                transcendentals=0,
                bytes_accessed=int(x_bytes * B_pad * H_pad
                                   + w_bytes * n_b * (M + 1) * H_pad * O_pad
                                   + 4 * O_pad + 4 * B_pad * O_pad)),
        )(alpha_w_folded, x_p, base_w_p, tv_w_p, b_p)

    return out_p[:B, :O]


# ------------------------------ reference / demo ----------------------------


def _reference_forward(x, base_params, task_vectors, alpha_raw, beta,
                       normalization="softmax"):
    """Pure-JAX reference mirroring the PyTorch module's forward."""
    if normalization == "softmax":
        alpha = jax.nn.softmax(alpha_raw, axis=1)
    elif normalization == "tanh":
        alpha = jnp.tanh(alpha_raw)
    else:
        alpha = alpha_raw
    combined = {}
    for idx, name in enumerate(list(task_vectors[0].keys())):
        stacked = jnp.stack([tv[name] for tv in task_vectors], axis=-1)  # (..., M)
        merged = jnp.squeeze(stacked @ alpha[idx]) + jnp.squeeze(base_params[name])
        combined[name] = merged
    y = x @ combined["weight"] + combined["bias"]
    return beta * y


def _make_case(key, B, H, O, n_checkpoints):
    """Deterministic synthetic checkpoints (state dicts of the Linear model)."""
    num_models = n_checkpoints - 1
    keys = jax.random.split(key, 2 * n_checkpoints + 2)
    checkpoints = []
    for c in range(n_checkpoints):
        w = 0.1 * jax.random.normal(keys[2 * c], (H, O), dtype=jnp.float32)
        b = 0.1 * jax.random.normal(keys[2 * c + 1], (1, O), dtype=jnp.float32)
        checkpoints.append({"weight": w, "bias": b})
    base_params = checkpoints[0]
    task_vectors = [{k: c[k] - base_params[k] for k in c} for c in checkpoints[1:]]
    alpha_raw = (jnp.ones((2, num_models), jnp.float32)
                 + 0.05 * jax.random.normal(keys[-2], (2, num_models), jnp.float32))
    beta = jnp.asarray(1.25, jnp.float32)
    x = jax.random.normal(keys[-1], (B, H), dtype=jnp.float32)
    return x, base_params, task_vectors, alpha_raw, beta


if __name__ == "__main__":
    root = jax.random.PRNGKey(0)
    k1, k2, k3 = jax.random.split(root, 3)

    # --- case 1: small demo shape; exact f32 path + default bf16 path -------
    case1 = _make_case(k1, B=8, H=32, O=32, n_checkpoints=3)
    ref1 = _reference_forward(*case1)

    out_f32 = jax.block_until_ready(
        weighted_merge_forward(*case1, weight_dtype=jnp.float32, dot_dtype=None))
    assert out_f32.shape == (8, 32)
    assert jnp.allclose(out_f32, ref1, rtol=1e-4, atol=1e-5), "f32 fused path mismatch"

    out_bf16 = jax.block_until_ready(weighted_merge_forward(*case1))
    assert jnp.allclose(out_bf16, ref1, rtol=2e-2, atol=2e-2), "bf16 fused path mismatch"

    # --- case 2: multi-K-tile fused path (f32 accumulator scratch) ----------
    case2 = _make_case(k2, B=16, H=640, O=384, n_checkpoints=4)
    ref2 = _reference_forward(*case2)
    out2 = jax.block_until_ready(weighted_merge_forward(*case2))
    assert out2.shape == (16, 384)
    assert jnp.allclose(out2, ref2, rtol=2e-2, atol=3e-2), "multi-K fused path mismatch"

    # --- case 3: large-batch two-pass path (merge once, then tiled matmul) --
    case3 = _make_case(k3, B=2048, H=128, O=256, n_checkpoints=3)
    ref3 = _reference_forward(*case3)
    out3 = jax.block_until_ready(weighted_merge_forward(*case3))
    assert out3.shape == (2048, 256)
    assert jnp.allclose(out3, ref3, rtol=2e-2, atol=3e-2), "two-pass path mismatch"

    print("KERNEL_OK")
</pallas_src>

<mosaic_0001>
module attributes {stable_mosaic.version = 11 : i64} {
  func.func @_fused_merge_matmul_kernel(%arg0: i32, %arg1: i32, %arg2: i32, %arg3: memref<2xf32, #tpu.memory_space<smem>>, %arg4: memref<8x128xf32, #tpu.memory_space<vmem>>, %arg5: memref<128x128xf32, #tpu.memory_space<vmem>>, %arg6: memref<2x128x128xf32, #tpu.memory_space<vmem>>, %arg7: memref<1x128xf32, #tpu.memory_space<vmem>>, %arg8: memref<8x128xf32, #tpu.memory_space<vmem>>) attributes {dimension_semantics = [#tpu.dimension_semantics<parallel>, #tpu.dimension_semantics<parallel>, #tpu.dimension_semantics<arbitrary>], iteration_bounds = array<i64: 1, 1, 1>, scalar_prefetch = 1 : i64, scratch_operands = 0 : i64, tpu.core_type = #tpu.core_type<tc>, window_params = [{transform_indices = @transform_0, window_bounds = array<i64: 8, 128>}, {transform_indices = @transform_1, window_bounds = array<i64: 128, 128>}, {transform_indices = @transform_2, window_bounds = array<i64: 2, 128, 128>}, {transform_indices = @transform_3, window_bounds = array<i64: 1, 128>}, {transform_indices = @transform_4, window_bounds = array<i64: 8, 128>}]} {
    %c0 = arith.constant 0 : index
    %c0_0 = arith.constant 0 : index
    %0 = vector.load %arg5[%c0, %c0_0] : memref<128x128xf32, #tpu.memory_space<vmem>>, vector<128x128xf32>
    %c0_1 = arith.constant 0 : index
    %1 = memref.load %arg3[%c0_1] : memref<2xf32, #tpu.memory_space<smem>>
    %c0_2 = arith.constant 0 : index
    %c0_3 = arith.constant 0 : index
    %c0_4 = arith.constant 0 : index
    %2 = vector.load %arg6[%c0_2, %c0_3, %c0_4] : memref<2x128x128xf32, #tpu.memory_space<vmem>>, vector<1x128x128xf32>
    %3 = vector.shape_cast %2 : vector<1x128x128xf32> to vector<128x128xf32>
    %4 = vector.broadcast %1 : f32 to vector<128x128xf32>
    %5 = arith.mulf %4, %3 : vector<128x128xf32>
    %6 = arith.addf %0, %5 : vector<128x128xf32>
    %c1 = arith.constant 1 : index
    %7 = memref.load %arg3[%c1] : memref<2xf32, #tpu.memory_space<smem>>
    %c1_5 = arith.constant 1 : index
    %c0_6 = arith.constant 0 : index
    %c0_7 = arith.constant 0 : index
    %8 = vector.load %arg6[%c1_5, %c0_6, %c0_7] : memref<2x128x128xf32, #tpu.memory_space<vmem>>, vector<1x128x128xf32>
    %9 = vector.shape_cast %8 : vector<1x128x128xf32> to vector<128x128xf32>
    %10 = vector.broadcast %7 : f32 to vector<128x128xf32>
    %11 = arith.mulf %10, %9 : vector<128x128xf32>
    %12 = arith.addf %6, %11 : vector<128x128xf32>
    %c0_8 = arith.constant 0 : index
    %c0_9 = arith.constant 0 : index
    %13 = vector.load %arg4[%c0_8, %c0_9] : memref<8x128xf32, #tpu.memory_space<vmem>>, vector<8x128xf32>
    %cst = arith.constant dense<0.000000e+00> : vector<8x128xf32>
    %14 = tpu.matmul %13, %12, %cst {dimension_numbers = #tpu.dot_dimension_numbers<[1], [0], [0], [1], [0, 0, 1, 1], [], []>} : vector<8x128xf32>, vector<128x128xf32>, vector<8x128xf32> -> vector<8x128xf32>
    %c0_10 = arith.constant 0 : index
    %c0_11 = arith.constant 0 : index
    %15 = vector.load %arg7[%c0_10, %c0_11] : memref<1x128xf32, #tpu.memory_space<vmem>>, vector<1x128xf32>
    %16 = vector.broadcast %15 : vector<1x128xf32> to vector<8x128xf32>
    %17 = arith.addf %14, %16 : vector<8x128xf32>
    %c0_12 = arith.constant 0 : index
    %c0_13 = arith.constant 0 : index
    %18 = vector.load %arg8[%c0_12, %c0_13] : memref<8x128xf32, #tpu.memory_space<vmem>>, vector<8x128xf32>
    tpu.vector_store %arg8[%c0_12, %c0_13], %17 {strides = array<i32>} : memref<8x128xf32, #tpu.memory_space<vmem>>, vector<8x128xf32>,
    return
  }
  func.func @transform_0(%arg0: i32, %arg1: i32, %arg2: i32, %arg3: memref<2xf32, #tpu.memory_space<smem>>) -> (i32, i32) {
    %c0_i32 = arith.constant 0 : i32
    return %arg0, %arg2 : i32, i32
  }
  func.func @transform_1(%arg0: i32, %arg1: i32, %arg2: i32, %arg3: memref<2xf32, #tpu.memory_space<smem>>) -> (i32, i32) {
    %c0_i32 = arith.constant 0 : i32
    return %arg2, %arg1 : i32, i32
  }
  func.func @transform_2(%arg0: i32, %arg1: i32, %arg2: i32, %arg3: memref<2xf32, #tpu.memory_space<smem>>) -> (i32, i32, i32) {
    %c0_i32 = arith.constant 0 : i32
    %c0_i32_0 = arith.constant 0 : i32
    return %c0_i32, %arg2, %arg1 : i32, i32, i32
  }
  func.func @transform_3(%arg0: i32, %arg1: i32, %arg2: i32, %arg3: memref<2xf32, #tpu.memory_space<smem>>) -> (i32, i32) {
    %c0_i32 = arith.constant 0 : i32
    %c0_i32_0 = arith.constant 0 : i32
    return %c0_i32, %arg1 : i32, i32
  }
  func.func @transform_4(%arg0: i32, %arg1: i32, %arg2: i32, %arg3: memref<2xf32, #tpu.memory_space<smem>>) -> (i32, i32) {
    %c0_i32 = arith.constant 0 : i32
    return %arg0, %arg1 : i32, i32
  }
}

</mosaic_0001>

<bundles_post_ra>
// kernel: tpu_custom_call.1
= control target key start
LH: loop header
LB: loop body
LE: loop exit
PB: predicated region body
PF: predicated region fallthrough
CT: control target
= control target key end

     0   :  { %s433_s18 = smov [#allocation3]   ;;  %s543_s0 = inlined_call_operand.hbm [shape: f32[2], index: 0, kind: input, shape index: {}]   ;;  %s544_s1 = inlined_call_operand.hbm [shape: f32[8,128], index: 1, kind: input, shape index: {}]   ;;  %s545_s2 = inlined_call_operand.hbm [shape: f32[128,128], index: 2, kind: input, shape index: {}]   ;;  %s546_s3 = inlined_call_operand.hbm [shape: f32[2,128,128], index: 3, kind: input, shape index: {}]   ;;  %s547_s4 = inlined_call_operand.vmem [shape: f32[1,128], index: 4, kind: input, shape index: {}]   ;;  %s548_s5 = inlined_call_operand.hbm [shape: f32[8,128], index: 5, kind: output, shape index: {}]  }
   0x1   :  { %11 = dma.hbm_to_smem %s543_s0, 16, %s433_s18, [#allocation2] }
   0x2   :  { %425 = dma.done.wait [#allocation2], 16 }
   0x3   :  { %426 = vsyncadd [#allocation2], 4294967280 }
   0x4   :  { %13 = sfence }
   0x5   :  { %14 = vsyncpa [#allocation5], 0 }
   0x6   :  { %15 = vsyncpa [#allocation8], 0 }
   0x7   :  { %16 = vsyncpa [#allocation6], 0  ;;  %s434_s21 = smov [#allocation7]  }
   0x8   :  { %s32_s22 = sshll.u32 %s434_s21, 4  ;;  %s33_s22 = int_to_ptr.vmem [resolvable:$true] %s32_s22 }
   0x9   :  { %s353_s23 = scalar_lea.vmem %s33_s22, 2048  ;;  %p358_p1 = scmp.lt.s32.totalorder %s33_s22, %s33_s22 }
   0xa   :  { %p354_p0 = scmp.ne.s32.totalorder %s33_s22, %s353_s23  ;;  %p359_p2 = scmp.lt.s32.totalorder %s353_s23, %s353_s23 }
   0xc   :  { %p360_p3 = por %p359_p2, %p358_p1 }
   0xe   :  { %p361_p4 = pnand %p360_p3, %p354_p0 }
  0x10   :  { %364 = shalt.err (!%p361_p4)
}
  0x11   :  { %s435_s24 = smov 128   ;;  %s436_s25 = smov 8  }
  0x12   :  { %38 = dma.hbm_to_vmem [thread:$0]  %s545_s2, 2048, %s33_s22, [#allocation8], %s435_s24, %s435_s24, %s436_s25  }
  0x13   :  { %s437_s27 = smov [#allocation4]   ;;  %s438_s29 = smov [#allocation9]  }
  0x14   :  { %s23_s28 = sshll.u32 %s437_s27, 4  ;;  %s44_s30 = sshll.u32 %s438_s29, 4  ;;  %s24_s28 = int_to_ptr.vmem [resolvable:$true] %s23_s28  ;;  %s45_s30 = int_to_ptr.vmem [resolvable:$true] %s44_s30 }
  0x15   :  { %s373_s6 = scalar_lea.vmem %s24_s28, 128  ;;  %p378_p6 = scmp.lt.s32.totalorder %s24_s28, %s24_s28 }
  0x16   :  { %p374_p5 = scmp.ne.s32.totalorder %s24_s28, %s373_s6  ;;  %p379_p7 = scmp.lt.s32.totalorder %s373_s6, %s373_s6 }
  0x18   :  { %p380_p8 = por %p379_p7, %p378_p6 }
  0x1a   :  { %p381_p9 = pnand %p380_p8, %p374_p5 }
  0x1c   :  { %384 = shalt.err (!%p381_p9)
}
  0x1d   :  { %26 = dma.hbm_to_vmem [thread:$0]  %s544_s1, 128, %s24_s28, [#allocation5]  }
  0x1e   :  { %s393_s9 = scalar_lea.vmem %s45_s30, 4096  ;;  %p398_p11 = scmp.lt.s32.totalorder %s45_s30, %s45_s30 }
  0x1f   :  { %p394_p10 = scmp.ne.s32.totalorder %s45_s30, %s393_s9  ;;  %p399_p12 = scmp.lt.s32.totalorder %s393_s9, %s393_s9 }
  0x21   :  { %p400_p13 = por %p399_p12, %p398_p11 }
  0x23   :  { %p401_p0 = pnand %p400_p13, %p394_p10 }
  0x25   :  { %404 = shalt.err (!%p401_p0)
}
  0x26   :  { %50 = dma.hbm_to_vmem [thread:$0]  %s546_s3, 4096, %s45_s30, [#allocation8], %s435_s24, %s435_s24, %s436_s25  }
  0x27   :  { %427 = dma.done.wait [#allocation5], 128  }
  0x28   :  { %428 = vsyncadd [#allocation5], 4294967168 }
  0x29   :  { %429 = dma.done.wait [#allocation8], 6144  }
  0x2a   :  { %430 = vsyncadd [#allocation8], 4294961152  ;;  %v439_v0 = vmov 0.0   ;;  %s78_s1 = sld [smem:[#allocation3]]  ;;  %vm440_vm0 = vmmov 0   ;;  %v77_v1 = vld [vmem:[#allocation7 + $0x78] sm:$0xff] }
  0x2b   :  { %293 = vmatprep.subr.mxu0 %v439_v0  ;;  %325 = vmatprep.mubr.msk.f32.mxu0 %vm440_vm0, %v439_v0  ;;  %s274_s11 = sld [smem:[#allocation3 + $0x1]]  ;;  %v94_v2 = vld [vmem:[#allocation9 + $0x78] sm:$0xff]  ;;  %v76_v7 = vld [vmem:[#allocation7 + $0x70] sm:$0xff]  ;;  %v75_v13 = vld [vmem:[#allocation7 + $0x68] sm:$0xff]  ;;  %s441_s13 = smov [#allocation10]  }
  0x2c   :  { %v145_v4 = vld [vmem:[#allocation9 + $0xf8] sm:$0xff]  ;;  %v93_v8 = vld [vmem:[#allocation9 + $0x70] sm:$0xff]  ;;  %v92_v14 = vld [vmem:[#allocation9 + $0x68] sm:$0xff]  ;;  %s264_s14 = sshll.u32 %s441_s13, 4  ;;  %s265_s14 = int_to_ptr.vmem [resolvable:$true] %s264_s14 }
  0x2d   :  { %v144_v9 = vld [vmem:[#allocation9 + $0xf0] sm:$0xff]  ;;  %v143_v15 = vld [vmem:[#allocation9 + $0xe8] sm:$0xff]  ;;  %v74_v19 = vld [vmem:[#allocation7 + $0x60] sm:$0xff]  ;;  %s405_s15 = scalar_lea.vmem %s265_s14, 128  ;;  %p410_p2 = scmp.lt.s32.totalorder %s265_s14, %s265_s14 }
  0x2e   :  { %v91_v20 = vld [vmem:[#allocation9 + $0x60] sm:$0xff]  ;;  %v73_v24 = vld [vmem:[#allocation7 + $0x58] sm:$0xff]  ;;  %v89_v31 = vld [vmem:[#allocation9 + $0x50] sm:$0xff]  ;;  %p406_p1 = scmp.ne.s32.totalorder %s265_s14, %s405_s15  ;;  %p411_p3 = scmp.lt.s32.totalorder %s405_s15, %s405_s15 }
  0x2f   :  { %v142_v21 = vld [vmem:[#allocation9 + $0xe0] sm:$0xff]  ;;  %v90_v25 = vld [vmem:[#allocation9 + $0x58] sm:$0xff]  ;;  %v72_v34 = vld [vmem:[#allocation7 + $0x50] sm:$0xff] }
  0x30   :  { %v486_v3 = vstv %s78_s1  ;;  %v141_v26 = vld [vmem:[#allocation9 + $0xd8] sm:$0xff]  ;;  %v140_v36 = vld [vmem:[#allocation9 + $0xd0] sm:$0xff]  ;;  %v88_v37 = vld [vmem:[#allocation9 + $0x48] sm:$0xff]  ;;  %p412_p4 = por %p411_p3, %p410_p2 }
  0x31   :  { %v111_v5 = vmul.f32 %v486_v3, %v94_v2  ;;  %v489_v6 = vstv %s274_s11  ;;  %v110_v11 = vmul.f32 %v486_v3, %v93_v8  ;;  %v109_v17 = vmul.f32 %v486_v3, %v92_v14  ;;  %v87_v42 = vld [vmem:[#allocation9 + $0x40] sm:$0xff]  ;;  %v71_v43 = vld [vmem:[#allocation7 + $0x48] sm:$0xff]  ;;  %v86_v45 = vld [vmem:[#allocation9 + $0x38] sm:$0xff] }
  0x32   :  { %v162_v10 = vmul.f32 %v489_v6, %v145_v4  ;;  %v161_v12 = vmul.f32 %v489_v6, %v144_v9  ;;  %v160_v18 = vmul.f32 %v489_v6, %v143_v15  ;;  %v108_v23 = vmul.f32 %v486_v3, %v91_v20  ;;  %v139_v44 = vld [vmem:[#allocation9 + $0xc8] sm:$0xff]  ;;  %v70_v50 = vld [vmem:[#allocation7 + $0x40] sm:$0xff]  ;;  %v85_v52 = vld [vmem:[#allocation9 + $0x30] sm:$0xff]  ;;  %p413_p5 = pnand %p412_p4, %p406_p1 }
  0x33   :  { %v127_v16 = vadd.f32 %v111_v5, %v77_v1  ;;  %v126_v22 = vadd.f32 %v110_v11, %v76_v7  ;;  %v125_v28 = vadd.f32 %v109_v17, %v75_v13  ;;  %v159_v29 = vmul.f32 %v489_v6, %v142_v21  ;;  %v138_v51 = vld [vmem:[#allocation9 + $0xc0] sm:$0xff]  ;;  %v69_v57 = vld [vmem:[#allocation7 + $0x38] sm:$0xff]  ;;  %v84_v59 = vld [vmem:[#allocation9 + $0x28] sm:$0xff] }
  0x34   :  { %v107_v30 = vmul.f32 %v486_v3, %v90_v25  ;;  %v124_v33 = vadd.f32 %v108_v23, %v74_v19  ;;  %v106_v35 = vmul.f32 %v486_v3, %v89_v31  ;;  %v158_v40 = vmul.f32 %v489_v6, %v141_v26  ;;  %v137_v58 = vld [vmem:[#allocation9 + $0xb8] sm:$0xff]  ;;  %v68_v1 = vld [vmem:[#allocation7 + $0x30] sm:$0xff]  ;;  %v83_v4 = vld [vmem:[#allocation9 + $0x20] sm:$0xff] }
  0x35   :  { %v178_v27 = vadd.f32 %v162_v10, %v127_v16  ;;  %v177_v32 = vadd.f32 %v161_v12, %v126_v22  ;;  %v176_v38 = vadd.f32 %v160_v18, %v125_v28  ;;  %v105_v41 = vmul.f32 %v486_v3, %v88_v37  ;;  %v136_v2 = vld [vmem:[#allocation9 + $0xb0] sm:$0xff]  ;;  %v67_v10 = vld [vmem:[#allocation7 + $0x28] sm:$0xff]  ;;  %v82_v12 = vld [vmem:[#allocation9 + $0x18] sm:$0xff] }
  0x36   :  { %v123_v39 = vadd.f32 %v107_v30, %v73_v24  ;;  %v175_v46 = vadd.f32 %v159_v29, %v124_v33  ;;  %v122_v47 = vadd.f32 %v106_v35, %v72_v34  ;;  %v157_v48 = vmul.f32 %v489_v6, %v140_v36  ;;  %v135_v11 = vld [vmem:[#allocation9 + $0xa8] sm:$0xff]  ;;  %v66_v17 = vld [vmem:[#allocation7 + $0x20] sm:$0xff]  ;;  %v81_v19 = vld [vmem:[#allocation9 + $0x10] sm:$0xff] }
  0x37   :  { %294 = vmatpush3.msra.mxu0 %v178_v27  ;;  %v104_v49 = vmul.f32 %v486_v3, %v87_v42  ;;  %v121_v54 = vadd.f32 %v105_v41, %v71_v43  ;;  %v156_v55 = vmul.f32 %v489_v6, %v139_v44  ;;  %v103_v56 = vmul.f32 %v486_v3, %v86_v45  ;;  %v134_v18 = vld [vmem:[#allocation9 + $0xa0] sm:$0xff]  ;;  %v65_v24 = vld [vmem:[#allocation7 + $0x18] sm:$0xff]  ;;  %v80_v26 = vld [vmem:[#allocation9 + $0x8] sm:$0xff] }
  0x38   :  { %295 = vmatprep.subr.mxu0 %v439_v0  ;;  %v174_v53 = vadd.f32 %v158_v40, %v123_v39  ;;  %v173_v60 = vadd.f32 %v157_v48, %v122_v47  ;;  %v155_v62 = vmul.f32 %v489_v6, %v138_v51  ;;  %v102_v63 = vmul.f32 %v486_v3, %v85_v52  ;;  %v133_v25 = vld [vmem:[#allocation9 + $0x98] sm:$0xff]  ;;  %v64_v31 = vld [vmem:[#allocation7 + $0x10] sm:$0xff]  ;;  %v79_v33 = vld [vmem:[#allocation9] sm:$0xff] }
  0x39   :  { %296 = vmatpush3.msra.mxu0 %v177_v32  ;;  %v120_v61 = vadd.f32 %v104_v49, %v70_v50  ;;  %v172_v5 = vadd.f32 %v156_v55, %v121_v54  ;;  %v119_v7 = vadd.f32 %v103_v56, %v69_v57  ;;  %v154_v8 = vmul.f32 %v489_v6, %v137_v58  ;;  %v132_v32 = vld [vmem:[#allocation9 + $0x90] sm:$0xff]  ;;  %v131_v39 = vld [vmem:[#allocation9 + $0x88] sm:$0xff]  ;;  %v62_v44 = vld [vmem:[#allocation7] sm:$0xff] }
  0x3a   :  { %297 = vmatprep.subr.mxu0 %v439_v0  ;;  %v101_v9 = vmul.f32 %v486_v3, %v84_v59  ;;  %v118_v14 = vadd.f32 %v102_v63, %v68_v1  ;;  %v153_v15 = vmul.f32 %v489_v6, %v136_v2  ;;  %v100_v16 = vmul.f32 %v486_v3, %v83_v4  ;;  %v130_v45 = vld [vmem:[#allocation9 + $0x80] sm:$0xff] }
  0x3b   :  { %298 = vmatpush3.msra.mxu0 %v176_v38  ;;  %v171_v13 = vadd.f32 %v155_v62, %v120_v61  ;;  %v170_v20 = vadd.f32 %v154_v8, %v119_v7  ;;  %v152_v22 = vmul.f32 %v489_v6, %v135_v11  ;;  %v99_v23 = vmul.f32 %v486_v3, %v82_v12  ;;  %v63_v38 = vld [vmem:[#allocation7 + $0x8] sm:$0xff] }
  0x3c   :  { %299 = vmatprep.subr.mxu0 %v439_v0  ;;  %v117_v21 = vadd.f32 %v101_v9, %v67_v10  ;;  %v169_v27 = vadd.f32 %v153_v15, %v118_v14  ;;  %v116_v28 = vadd.f32 %v100_v16, %v66_v17  ;;  %v151_v29 = vmul.f32 %v489_v6, %v134_v18 }
  0x3d   :  { %300 = vmatpush3.msra.mxu0 %v175_v46  ;;  %v98_v30 = vmul.f32 %v486_v3, %v81_v19  ;;  %v115_v35 = vadd.f32 %v99_v23, %v65_v24  ;;  %v150_v36 = vmul.f32 %v489_v6, %v133_v25  ;;  %v97_v37 = vmul.f32 %v486_v3, %v80_v26 }
  0x3e   :  { %301 = vmatprep.subr.mxu0 %v439_v0  ;;  %v168_v34 = vadd.f32 %v152_v22, %v117_v21  ;;  %v167_v40 = vadd.f32 %v151_v29, %v116_v28  ;;  %v149_v42 = vmul.f32 %v489_v6, %v132_v32  ;;  %v96_v43 = vmul.f32 %v486_v3, %v79_v33 }
  0x3f   :  { %302 = vmatpush3.msra.mxu0 %v174_v53  ;;  %v114_v41 = vadd.f32 %v98_v30, %v64_v31  ;;  %v166_v46 = vadd.f32 %v150_v36, %v115_v35  ;;  %v113_v47 = vadd.f32 %v97_v37, %v63_v38  ;;  %v148_v48 = vmul.f32 %v489_v6, %v131_v39  ;;  %v179_v53 = vld [vmem:[#allocation4] sm:$0xff] }
  0x40   :  { %303 = vmatprep.subr.mxu0 %v439_v0  ;;  %v112_v50 = vadd.f32 %v96_v43, %v62_v44  ;;  %v147_v51 = vmul.f32 %v489_v6, %v130_v45  ;;  %v275_v6 = vld [vmem:[%s547_s4] ss:$0 sm:$0xff] }
  0x41   :  { %304 = vmatpush3.msra.mxu0 %v173_v60  ;;  %v165_v49 = vadd.f32 %v149_v42, %v114_v41  ;;  %v164_v3 = vadd.f32 %v148_v48, %v113_v47 }
  0x42   :  { %305 = vmatprep.subr.mxu0 %v439_v0  ;;  %v163_v52 = vadd.f32 %v147_v51, %v112_v50 }
  0x43   :  { %306 = vmatpush3.msra.mxu0 %v172_v5 }
  0x44   :  { %307 = vmatprep.subr.mxu0 %v439_v0 }
  0x45   :  { %308 = vmatpush3.msra.mxu0 %v171_v13 }
  0x46   :  { %309 = vmatprep.subr.mxu0 %v439_v0 }
  0x47   :  { %310 = vmatpush3.msra.mxu0 %v170_v20 }
  0x48   :  { %311 = vmatprep.subr.mxu0 %v439_v0 }
  0x49   :  { %312 = vmatpush3.msra.mxu0 %v169_v27 }
  0x4a   :  { %313 = vmatprep.subr.mxu0 %v439_v0 }
  0x4b   :  { %314 = vmatpush3.msra.mxu0 %v168_v34 }
  0x4c   :  { %315 = vmatprep.subr.mxu0 %v439_v0 }
  0x4d   :  { %316 = vmatpush3.msra.mxu0 %v167_v40 }
  0x4e   :  { %317 = vmatprep.subr.mxu0 %v439_v0 }
  0x4f   :  { %318 = vmatpush3.msra.mxu0 %v166_v46 }
  0x50   :  { %319 = vmatprep.subr.mxu0 %v439_v0 }
  0x51   :  { %320 = vmatpush3.msra.mxu0 %v165_v49 }
  0x52   :  { %321 = vmatprep.subr.mxu0 %v439_v0 }
  0x53   :  { %322 = vmatpush3.msra.mxu0 %v164_v3 }
  0x54   :  { %323 = vmatprep.subr.mxu0 %v439_v0 }
  0x55   :  { %324 = vmatpush3.msra.mxu0 %v163_v52 }
  0x56   :  { %326 = vmatmul.mubr.f32.vlgmr.msra.gmra.mxu0 %v179_v53 }
 0x116   :  { %v253_v54 = vpop.f32.mrf.mxu0 }
 0x117   :  { %v254_v55 = vadd.f32 %v275_v6, %v253_v54 }
 0x118   :  { %v327_v56 = vpop.f32.mrf.mxu0 }
 0x119   :  { %257 = vst [vmem:[#allocation10] sm:$0xff] %v254_v55 }
 0x11a   :  { %416 = shalt.err (!%p413_p5)
}
 0x11b   :  { %267 = dma.vmem_to_hbm [thread:$0]  %s265_s14, 128, %s548_s5, [#allocation6]  }
 0x11c   :  { %431 = dma.done.wait [#allocation6], 128  }
 0x11d   :  { %432 = vsyncadd [#allocation6], 4294967168 }
 0x11e   :  { %271 = vsyncpa [#allocation5], 1 }
 0x11f   :  { %272 = vsyncpa [#allocation8], 1 }
 0x120   :  { %273 = vsyncpa [#allocation6], 1 }

</bundles_post_ra>
